<compile_context>
chip_gen: v7x
topology: tpu7x:2x2x1
jax: 0.10.0
libtpu: 0.0.40
codegen_flags: <defaults>
</compile_context>

<pallas_src>
import functools

import jax
import jax.numpy as jnp
from jax.experimental import pallas as pl
from jax.experimental.pallas import tpu as pltpu

LN_EPS = 1e-5
INV_SQRT2 = 0.7071067811865476


def _round_up(x, m):
    return ((x + m - 1) // m) * m


def _vmem_capacity_bytes():
    """Physical VMEM per core; conservative 64 MiB fallback (v7x) if query fails."""
    try:
        info = pltpu.get_tpu_info()
        cap = getattr(info, "vmem_capacity_bytes", None)
        if cap:
            return int(cap)
    except Exception:
        pass
    return 64 << 20


def _vmem_estimate(tm, th, D, x_bytes, out_bytes):
    """Itemized VMEM footprint (default double-buffering included, no fudge factor)."""
    return (
        2 * tm * D * x_bytes       # x tile, double-buffered
        + 2 * tm * D * out_bytes   # out tile, double-buffered
        + 2 * D * th * 2           # w1 tile (bf16), double-buffered
        + 2 * th * D * 2           # w2 tile (bf16), double-buffered
        + 2 * th * 4               # b1 tile, double-buffered
        + 2 * 3 * D * 4            # gamma, beta, b2 (constant blocks)
        + tm * D * 2               # xn scratch (bf16)
        + tm * D * 4               # acc scratch (f32)
        + tm * th * 4              # (tm, th) GELU intermediate (f32)
    )


def _pick_row_tile(rows, cap, prefer_even_tiles):
    """Row tile: multiple of 128 up to cap, minimizing padding waste; tiny inputs
    get a single 8-aligned tile (avoid MXU-sized padding for tiny batches)."""
    if rows <= 256:
        return _round_up(rows, 8)
    cap = max(cap, 256)
    cands = list(range(256, cap + 1, 128))

    def key(tm):
        rows_p = _round_up(rows, tm)
        odd = (rows_p // tm) % 2 if prefer_even_tiles else 0
        return (rows_p - rows, odd, -tm)

    return min(cands, key=key)


def _hidden_divisors(H):
    """Multiple-of-128 divisors of H (excluding H itself), descending."""
    return [t for t in range(((H - 1) // 128) * 128, 127, -128) if H % t == 0]


def _ffn_kernel(x_ref, gamma_ref, beta_ref, w1_ref, b1_ref, w2_ref, b2_ref,
                o_ref, xn_ref, acc_ref):
    # grid = (row tiles [parallel], hidden tiles [arbitrary, innermost])
    j = pl.program_id(1)

    @pl.when(j == 0)
    def _():
        # LayerNorm over last dim (biased variance, matches nn.LayerNorm); f32 stats.
        x = x_ref[...].astype(jnp.float32)
        mean = jnp.mean(x, axis=-1, keepdims=True)
        xc = x - mean
        var = jnp.mean(xc * xc, axis=-1, keepdims=True)
        inv = jax.lax.rsqrt(var + LN_EPS)
        xn = xc * inv * gamma_ref[...] + beta_ref[...]
        xn_ref[...] = xn.astype(xn_ref.dtype)          # bf16 MXU operand
        acc_ref[...] = jnp.zeros_like(acc_ref)

    # Linear(dim -> hidden tile): bf16 MXU operands, f32 accumulation.
    h = jnp.dot(xn_ref[...], w1_ref[...], preferred_element_type=jnp.float32)
    h = h + b1_ref[...]

    # GELU (exact erf form; matches nn.GELU() default).
    h = 0.5 * h * (1.0 + jax.lax.erf(h * INV_SQRT2))

    # Dropout(p=0.0) is identity at inference; omitted.
    # TODO(synk): training-mode dropout with PRNG not implemented (p=0.0 here).

    # Linear(hidden tile -> dim), accumulated across hidden tiles.
    acc_ref[...] += jnp.dot(h.astype(w2_ref.dtype), w2_ref[...],
                            preferred_element_type=jnp.float32)

    @pl.when(j == pl.num_programs(1) - 1)
    def _():
        o_ref[...] = (acc_ref[...] + b2_ref[...]).astype(o_ref.dtype)


@functools.partial(jax.jit, static_argnames=("tile_rows", "tile_hidden"))
def feed_forward(x, params, *, tile_rows=None, tile_hidden=512):
    """x: (B, N, D). params: gamma, beta, b1, b2 (f32), w1/w2 (preferably bf16)."""
    B, N, D = x.shape
    H = params["w1"].shape[1]
    rows = B * N

    vmem_cap = _vmem_capacity_bytes()
    budget = max(int(vmem_cap * 0.8), 16 << 20)   # headroom for compiler scratch/spills
    small_vmem = vmem_cap < (96 << 20)            # e.g. v7x: 64 MiB per TensorCore

    if tile_rows is None:
        tile_rows = 512 if small_vmem else 1024   # generation-aware row-tile cap

    # On small-VMEM parts with large batch, stream x as bf16 to halve the (tm, D)
    # activation tiles; LN statistics are still computed in f32 inside the kernel.
    x_dtype = jnp.bfloat16 if (small_vmem and rows >= 1024) else jnp.float32
    x_bytes = jnp.dtype(x_dtype).itemsize
    out_bytes = jnp.dtype(x.dtype).itemsize

    tm = _pick_row_tile(rows, tile_rows, prefer_even_tiles=small_vmem)

    # Prefer full weight residency (th = H): constant w1/w2 block indices -> the
    # weights are DMA'd exactly once per call, not once per row tile.
    th = H
    if _vmem_estimate(tm, th, D, x_bytes, out_bytes) > budget:
        divisors = _hidden_divisors(H)                      # descending, != H
        stream = [t for t in divisors if t <= tile_hidden] or divisors
        if stream:
            th = stream[0]
        # shrink tm first (keep multiple of 128, floor 256), then th further
        while _vmem_estimate(tm, th, D, x_bytes, out_bytes) > budget and tm > 256:
            tm -= 128
        for t in stream:
            if _vmem_estimate(tm, t, D, x_bytes, out_bytes) <= budget:
                th = t
                break
        else:
            if stream:
                th = stream[-1]   # smallest aligned divisor; best effort

    rows_p = _round_up(rows, tm)

    x2d = x.reshape(rows, D).astype(x_dtype)
    if rows_p != rows:
        x2d = jnp.pad(x2d, ((0, rows_p - rows), (0, 0)))

    # bf16 MXU operands. prepare_params() casts these once outside the jit, so
    # these astype calls are no-ops on the hot path (no per-call convert traffic).
    w1 = params["w1"].astype(jnp.bfloat16)
    w2 = params["w2"].astype(jnp.bfloat16)
    gamma = params["gamma"].astype(jnp.float32)
    beta = params["beta"].astype(jnp.float32)
    b1 = params["b1"].astype(jnp.float32)
    b2 = params["b2"].astype(jnp.float32)

    grid = (rows_p // tm, H // th)

    est = _vmem_estimate(tm, th, D, x_bytes, out_bytes)
    vmem_limit = int(min(max(est * 1.3, 16 << 20), budget))

    out2d = pl.pallas_call(
        _ffn_kernel,
        out_shape=jax.ShapeDtypeStruct((rows_p, D), x.dtype),
        grid_spec=pltpu.PrefetchScalarGridSpec(
            num_scalar_prefetch=0,
            grid=grid,
            in_specs=[
                pl.BlockSpec((tm, D), lambda i, j: (i, 0)),   # x rows
                pl.BlockSpec((1, D), lambda i, j: (0, 0)),    # gamma
                pl.BlockSpec((1, D), lambda i, j: (0, 0)),    # beta
                pl.BlockSpec((D, th), lambda i, j: (0, j)),   # w1 column tile
                pl.BlockSpec((1, th), lambda i, j: (0, j)),   # b1 tile
                pl.BlockSpec((th, D), lambda i, j: (j, 0)),   # w2 row tile
                pl.BlockSpec((1, D), lambda i, j: (0, 0)),    # b2
            ],
            out_specs=pl.BlockSpec((tm, D), lambda i, j: (i, 0)),
            scratch_shapes=[
                pltpu.VMEM((tm, D), jnp.bfloat16),   # normalized x (bf16 MXU operand)
                pltpu.VMEM((tm, D), jnp.float32),    # output accumulator
            ],
        ),
        compiler_params=pltpu.CompilerParams(
            dimension_semantics=("parallel", "arbitrary"),
            vmem_limit_bytes=vmem_limit,
        ),
    )(x2d, gamma, beta, w1, b1, w2, b2)

    return out2d[:rows].reshape(B, N, D)


def init_params(key, dim, hidden_dim):
    k1, k2, k3, k4 = jax.random.split(key, 4)
    # nn.Linear default init: U(-1/sqrt(fan_in), 1/sqrt(fan_in))
    lim1 = 1.0 / jnp.sqrt(dim)
    lim2 = 1.0 / jnp.sqrt(hidden_dim)
    return {
        "gamma": jnp.ones((1, dim), jnp.float32),
        "beta": jnp.zeros((1, dim), jnp.float32),
        "w1": jax.random.uniform(k1, (dim, hidden_dim), jnp.float32, -lim1, lim1),
        "b1": jax.random.uniform(k2, (1, hidden_dim), jnp.float32, -lim1, lim1),
        "w2": jax.random.uniform(k3, (hidden_dim, dim), jnp.float32, -lim2, lim2),
        "b2": jax.random.uniform(k4, (1, dim), jnp.float32, -lim2, lim2),
    }


def prepare_params(params):
    """One-time bf16 cast of the matmul weights, done outside the jitted forward."""
    p = dict(params)
    p["w1"] = params["w1"].astype(jnp.bfloat16)
    p["w2"] = params["w2"].astype(jnp.bfloat16)
    return p


def _reference(x, p):
    xf = x.astype(jnp.float32)
    mean = jnp.mean(xf, axis=-1, keepdims=True)
    var = jnp.mean((xf - mean) ** 2, axis=-1, keepdims=True)
    xn = (xf - mean) * jax.lax.rsqrt(var + LN_EPS) * p["gamma"][0] + p["beta"][0]
    h = xn @ p["w1"] + p["b1"][0]
    h = 0.5 * h * (1.0 + jax.lax.erf(h / jnp.sqrt(2.0)))
    return h @ p["w2"] + p["b2"][0]


if __name__ == "__main__":
    key = jax.random.PRNGKey(0)
    kx, kp = jax.random.split(key)

    # Small but lane-dense shapes: D and H are multiples of 128.
    B, N, dim, hidden_dim = 2, 8, 128, 256
    x = jax.random.normal(kx, (B, N, dim), jnp.float32)
    params = init_params(kp, dim, hidden_dim)
    ff_params = prepare_params(params)   # persistent bf16 weights (no per-call cast)

    out = feed_forward(x, ff_params)
    out = jax.block_until_ready(out)

    ref = _reference(x, params)
    assert out.shape == (B, N, dim)
    # bf16 MXU operands vs f32 reference -> loosened tolerance.
    assert jnp.allclose(out, ref, atol=2e-2, rtol=2e-2), "mismatch vs reference"
    print("KERNEL_OK")
</pallas_src>

<mosaic_0001>
module attributes {stable_mosaic.version = 11 : i64} {
  func.func @_ffn_kernel(%arg0: i32, %arg1: i32, %arg2: memref<16x128xf32, #tpu.memory_space<vmem>>, %arg3: memref<1x128xf32, #tpu.memory_space<vmem>>, %arg4: memref<1x128xf32, #tpu.memory_space<vmem>>, %arg5: memref<128x256xbf16, #tpu.memory_space<vmem>>, %arg6: memref<1x256xf32, #tpu.memory_space<vmem>>, %arg7: memref<256x128xbf16, #tpu.memory_space<vmem>>, %arg8: memref<1x128xf32, #tpu.memory_space<vmem>>, %arg9: memref<16x128xf32, #tpu.memory_space<vmem>>, %arg10: memref<16x128xbf16, #tpu.memory_space<vmem>>, %arg11: memref<16x128xf32, #tpu.memory_space<vmem>>) attributes {dimension_semantics = [#tpu.dimension_semantics<parallel>, #tpu.dimension_semantics<arbitrary>], iteration_bounds = array<i64: 1, 1>, scalar_prefetch = 0 : i64, scratch_operands = 2 : i64, tpu.core_type = #tpu.core_type<tc>, window_params = [{transform_indices = @transform_0, window_bounds = array<i64: 16, 128>}, {pipeline_mode = #tpu.pipeline_mode<synchronous>, transform_indices = @transform_1, window_bounds = array<i64: 1, 128>}, {pipeline_mode = #tpu.pipeline_mode<synchronous>, transform_indices = @transform_2, window_bounds = array<i64: 1, 128>}, {transform_indices = @transform_3, window_bounds = array<i64: 128, 256>}, {transform_indices = @transform_4, window_bounds = array<i64: 1, 256>}, {transform_indices = @transform_5, window_bounds = array<i64: 256, 128>}, {pipeline_mode = #tpu.pipeline_mode<synchronous>, transform_indices = @transform_6, window_bounds = array<i64: 1, 128>}, {transform_indices = @transform_7, window_bounds = array<i64: 16, 128>}]} {
    %c0_i32 = arith.constant 0 : i32
    %0 = arith.cmpi eq, %arg1, %c0_i32 : i32
    %1 = arith.extui %0 : i1 to i32
    %c0_i32_0 = arith.constant 0 : i32
    %2 = arith.cmpi ne, %1, %c0_i32_0 : i32
    scf.if %2 {
      %c0_18 = arith.constant 0 : index
      %c0_19 = arith.constant 0 : index
      %26 = vector.load %arg2[%c0_18, %c0_19] : memref<16x128xf32, #tpu.memory_space<vmem>>, vector<16x128xf32>
      %cst_20 = arith.constant dense<0.000000e+00> : vector<16xf32>
      %27 = vector.multi_reduction <add>, %26, %cst_20 [1] : vector<16x128xf32> to vector<16xf32>
      %28 = vector.shape_cast %27 : vector<16xf32> to vector<16x1xf32>
      %cst_21 = arith.constant 1.280000e+02 : f32
      %29 = vector.broadcast %cst_21 : f32 to vector<16x1xf32>
      %30 = arith.divf %28, %29 : vector<16x1xf32>
      %31 = vector.broadcast %30 : vector<16x1xf32> to vector<16x128xf32>
      %32 = arith.subf %26, %31 : vector<16x128xf32>
      %33 = arith.mulf %32, %32 : vector<16x128xf32>
      %cst_22 = arith.constant dense<0.000000e+00> : vector<16xf32>
      %34 = vector.multi_reduction <add>, %33, %cst_22 [1] : vector<16x128xf32> to vector<16xf32>
      %35 = vector.shape_cast %34 : vector<16xf32> to vector<16x1xf32>
      %cst_23 = arith.constant 1.280000e+02 : f32
      %36 = vector.broadcast %cst_23 : f32 to vector<16x1xf32>
      %37 = arith.divf %35, %36 : vector<16x1xf32>
      %cst_24 = arith.constant 9.99999974E-6 : f32
      %38 = vector.broadcast %cst_24 : f32 to vector<16x1xf32>
      %39 = arith.addf %37, %38 : vector<16x1xf32>
      %40 = math.rsqrt %39 : vector<16x1xf32>
      %41 = vector.broadcast %40 : vector<16x1xf32> to vector<16x128xf32>
      %42 = arith.mulf %32, %41 : vector<16x128xf32>
      %c0_25 = arith.constant 0 : index
      %c0_26 = arith.constant 0 : index
      %43 = vector.load %arg3[%c0_25, %c0_26] : memref<1x128xf32, #tpu.memory_space<vmem>>, vector<1x128xf32>
      %44 = vector.broadcast %43 : vector<1x128xf32> to vector<16x128xf32>
      %45 = arith.mulf %42, %44 : vector<16x128xf32>
      %c0_27 = arith.constant 0 : index
      %c0_28 = arith.constant 0 : index
      %46 = vector.load %arg4[%c0_27, %c0_28] : memref<1x128xf32, #tpu.memory_space<vmem>>, vector<1x128xf32>
      %47 = vector.broadcast %46 : vector<1x128xf32> to vector<16x128xf32>
      %48 = arith.addf %45, %47 : vector<16x128xf32>
      %49 = arith.truncf %48 : vector<16x128xf32> to vector<16x128xbf16>
      %c0_29 = arith.constant 0 : index
      %c0_30 = arith.constant 0 : index
      %50 = vector.load %arg10[%c0_29, %c0_30] : memref<16x128xbf16, #tpu.memory_space<vmem>>, vector<16x128xbf16>
      tpu.vector_store %arg10[%c0_29, %c0_30], %49 {strides = array<i32>} : memref<16x128xbf16, #tpu.memory_space<vmem>>, vector<16x128xbf16>,
      %cst_31 = arith.constant 0.000000e+00 : f32
      %51 = vector.broadcast %cst_31 : f32 to vector<16x128xf32>
      %c0_32 = arith.constant 0 : index
      %c0_33 = arith.constant 0 : index
      %52 = vector.load %arg11[%c0_32, %c0_33] : memref<16x128xf32, #tpu.memory_space<vmem>>, vector<16x128xf32>
      tpu.vector_store %arg11[%c0_32, %c0_33], %51 {strides = array<i32>} : memref<16x128xf32, #tpu.memory_space<vmem>>, vector<16x128xf32>,
    } else {
    }
    %c0 = arith.constant 0 : index
    %c0_1 = arith.constant 0 : index
    %3 = vector.load %arg10[%c0, %c0_1] : memref<16x128xbf16, #tpu.memory_space<vmem>>, vector<16x128xbf16>
    %c0_2 = arith.constant 0 : index
    %c0_3 = arith.constant 0 : index
    %4 = vector.load %arg5[%c0_2, %c0_3] : memref<128x256xbf16, #tpu.memory_space<vmem>>, vector<128x256xbf16>
    %cst = arith.constant dense<0.000000e+00> : vector<16x256xf32>
    %5 = tpu.matmul %3, %4, %cst {dimension_numbers = #tpu.dot_dimension_numbers<[1], [0], [0], [1], [0, 0, 1, 1], [], []>} : vector<16x128xbf16>, vector<128x256xbf16>, vector<16x256xf32> -> vector<16x256xf32>
    %c0_4 = arith.constant 0 : index
    %c0_5 = arith.constant 0 : index
    %6 = vector.load %arg6[%c0_4, %c0_5] : memref<1x256xf32, #tpu.memory_space<vmem>>, vector<1x256xf32>
    %7 = vector.broadcast %6 : vector<1x256xf32> to vector<16x256xf32>
    %8 = arith.addf %5, %7 : vector<16x256xf32>
    %cst_6 = arith.constant 5.000000e-01 : f32
    %9 = vector.broadcast %cst_6 : f32 to vector<16x256xf32>
    %10 = arith.mulf %9, %8 : vector<16x256xf32>
    %cst_7 = arith.constant 0.707106769 : f32
    %11 = vector.broadcast %cst_7 : f32 to vector<16x256xf32>
    %12 = arith.mulf %8, %11 : vector<16x256xf32>
    %13 = math.erf %12 : vector<16x256xf32>
    %cst_8 = arith.constant 1.000000e+00 : f32
    %14 = vector.broadcast %cst_8 : f32 to vector<16x256xf32>
    %15 = arith.addf %14, %13 : vector<16x256xf32>
    %16 = arith.mulf %10, %15 : vector<16x256xf32>
    %c0_9 = arith.constant 0 : index
    %c0_10 = arith.constant 0 : index
    %17 = vector.load %arg11[%c0_9, %c0_10] : memref<16x128xf32, #tpu.memory_space<vmem>>, vector<16x128xf32>
    %18 = arith.truncf %16 : vector<16x256xf32> to vector<16x256xbf16>
    %c0_11 = arith.constant 0 : index
    %c0_12 = arith.constant 0 : index
    %19 = vector.load %arg7[%c0_11, %c0_12] : memref<256x128xbf16, #tpu.memory_space<vmem>>, vector<256x128xbf16>
    %cst_13 = arith.constant dense<0.000000e+00> : vector<16x128xf32>
    %20 = tpu.matmul %18, %19, %cst_13 {dimension_numbers = #tpu.dot_dimension_numbers<[1], [0], [0], [1], [0, 0, 1, 1], [], []>} : vector<16x256xbf16>, vector<256x128xbf16>, vector<16x128xf32> -> vector<16x128xf32>
    %21 = arith.addf %17, %20 : vector<16x128xf32>
    %c0_14 = arith.constant 0 : index
    %c0_15 = arith.constant 0 : index
    %22 = vector.load %arg11[%c0_14, %c0_15] : memref<16x128xf32, #tpu.memory_space<vmem>>, vector<16x128xf32>
    tpu.vector_store %arg11[%c0_14, %c0_15], %21 {strides = array<i32>} : memref<16x128xf32, #tpu.memory_space<vmem>>, vector<16x128xf32>,
    %c0_i32_16 = arith.constant 0 : i32
    %23 = arith.cmpi eq, %arg1, %c0_i32_16 : i32
    %24 = arith.extui %23 : i1 to i32
    %c0_i32_17 = arith.constant 0 : i32
    %25 = arith.cmpi ne, %24, %c0_i32_17 : i32
    scf.if %25 {
      %c0_18 = arith.constant 0 : index
      %c0_19 = arith.constant 0 : index
      %26 = vector.load %arg11[%c0_18, %c0_19] : memref<16x128xf32, #tpu.memory_space<vmem>>, vector<16x128xf32>
      %c0_20 = arith.constant 0 : index
      %c0_21 = arith.constant 0 : index
      %27 = vector.load %arg8[%c0_20, %c0_21] : memref<1x128xf32, #tpu.memory_space<vmem>>, vector<1x128xf32>
      %28 = vector.broadcast %27 : vector<1x128xf32> to vector<16x128xf32>
      %29 = arith.addf %26, %28 : vector<16x128xf32>
      %c0_22 = arith.constant 0 : index
      %c0_23 = arith.constant 0 : index
      %30 = vector.load %arg9[%c0_22, %c0_23] : memref<16x128xf32, #tpu.memory_space<vmem>>, vector<16x128xf32>
      tpu.vector_store %arg9[%c0_22, %c0_23], %29 {strides = array<i32>} : memref<16x128xf32, #tpu.memory_space<vmem>>, vector<16x128xf32>,
    } else {
    }
    return
  }
  func.func @transform_0(%arg0: i32, %arg1: i32) -> (i32, i32) {
    %c0_i32 = arith.constant 0 : i32
    %c0_i32_0 = arith.constant 0 : i32
    return %arg0, %c0_i32 : i32, i32
  }
  func.func @transform_1(%arg0: i32, %arg1: i32) -> (i32, i32) {
    %c0_i32 = arith.constant 0 : i32
    %c0_i32_0 = arith.constant 0 : i32
    %c0_i32_1 = arith.constant 0 : i32
    return %c0_i32, %c0_i32_0 : i32, i32
  }
  func.func @transform_2(%arg0: i32, %arg1: i32) -> (i32, i32) {
    %c0_i32 = arith.constant 0 : i32
    %c0_i32_0 = arith.constant 0 : i32
    %c0_i32_1 = arith.constant 0 : i32
    return %c0_i32, %c0_i32_0 : i32, i32
  }
  func.func @transform_3(%arg0: i32, %arg1: i32) -> (i32, i32) {
    %c0_i32 = arith.constant 0 : i32
    %c0_i32_0 = arith.constant 0 : i32
    return %c0_i32, %arg1 : i32, i32
  }
  func.func @transform_4(%arg0: i32, %arg1: i32) -> (i32, i32) {
    %c0_i32 = arith.constant 0 : i32
    %c0_i32_0 = arith.constant 0 : i32
    return %c0_i32, %arg1 : i32, i32
  }
  func.func @transform_5(%arg0: i32, %arg1: i32) -> (i32, i32) {
    %c0_i32 = arith.constant 0 : i32
    %c0_i32_0 = arith.constant 0 : i32
    return %arg1, %c0_i32 : i32, i32
  }
  func.func @transform_6(%arg0: i32, %arg1: i32) -> (i32, i32) {
    %c0_i32 = arith.constant 0 : i32
    %c0_i32_0 = arith.constant 0 : i32
    %c0_i32_1 = arith.constant 0 : i32
    return %c0_i32, %c0_i32_0 : i32, i32
  }
  func.func @transform_7(%arg0: i32, %arg1: i32) -> (i32, i32) {
    %c0_i32 = arith.constant 0 : i32
    %c0_i32_0 = arith.constant 0 : i32
    return %arg0, %c0_i32 : i32, i32
  }
}

</mosaic_0001>

<bundles_post_ra>
// kernel: feed_forward.1
= control target key start
LH: loop header
LB: loop body
LE: loop exit
PB: predicated region body
PF: predicated region fallthrough
CT: control target
= control target key end

     0   :  { %12 = vsyncpa [#allocation5], 0  ;;  %s840_s0 = inlined_call_operand.hbm [shape: f32[16,128], index: 0, kind: input, shape index: {}]   ;;  %s841_s1 = inlined_call_operand.vmem [shape: f32[1,128], index: 1, kind: input, shape index: {}]   ;;  %s842_s2 = inlined_call_operand.vmem [shape: f32[1,128], index: 2, kind: input, shape index: {}]   ;;  %s843_s3 = inlined_call_operand.hbm [shape: bf16[128,256], index: 3, kind: input, shape index: {}]   ;;  %s844_s4 = inlined_call_operand.vmem [shape: f32[1,256], index: 4, kind: input, shape index: {}]   ;;  %s845_s5 = inlined_call_operand.hbm [shape: bf16[256,128], index: 5, kind: input, shape index: {}]   ;;  %s846_s6 = inlined_call_operand.vmem [shape: f32[1,128], index: 6, kind: input, shape index: {}]   ;;  %s847_s7 = inlined_call_operand.hbm [shape: f32[16,128], index: 7, kind: output, shape index: {}]  }
   0x1   :  { %13 = vsyncpa [#allocation8], 0 }
   0x2   :  { %14 = vsyncpa [#allocation6], 0  ;;  %s715_s24 = smov [#allocation7]   ;;  %s716_s26 = smov [#allocation4]  }
   0x3   :  { %s36_s25 = sshll.u32 %s715_s24, 4  ;;  %s20_s27 = sshll.u32 %s716_s26, 4  ;;  %s37_s25 = int_to_ptr.vmem [resolvable:$true] %s36_s25  ;;  %s764_s27 = int_to_ptr.vmem [resolvable:$true] %s20_s27 }
   0x4   :  { %s621_s30 = scalar_lea.hbm %s843_s3, 2048 }
   0x5   :  { %p622_p0 = scmp.ne.s32.totalorder %s843_s3, %s621_s30  ;;  %p625_p1 = scmp.lt.u32.totalorder %s621_s30, %s843_s3 }
   0x7   :  { %p627_p2 = pnand %p625_p1, %p622_p0 }
   0x9   :  { %630 = shalt.err (!%p627_p2)
}
   0xa   :  { %s631_s12 = scalar_lea.vmem %s37_s25, 2048  ;;  %p636_p4 = scmp.lt.s32.totalorder %s37_s25, %s37_s25 }
   0xb   :  { %p632_p3 = scmp.ne.s32.totalorder %s37_s25, %s631_s12  ;;  %p637_p5 = scmp.lt.s32.totalorder %s631_s12, %s631_s12 }
   0xd   :  { %p638_p6 = por %p637_p5, %p636_p4 }
   0xf   :  { %p639_p7 = pnand %p638_p6, %p632_p3 }
  0x11   :  { %642 = shalt.err (!%p639_p7)
}
  0x12   :  { %s717_s13 = smov 128   ;;  %s718_s14 = smov 8  }
  0x13   :  { %42 = dma.hbm_to_vmem [thread:$0]  %s843_s3, 2048, %s37_s25, [#allocation8], %s717_s13, %s717_s13, %s718_s14  }
  0x14   :  { %s643_s19 = scalar_lea.hbm %s840_s0, 256 }
  0x15   :  { %p644_p8 = scmp.ne.s32.totalorder %s840_s0, %s643_s19  ;;  %p647_p9 = scmp.lt.u32.totalorder %s643_s19, %s840_s0 }
  0x17   :  { %p649_p10 = pnand %p647_p9, %p644_p8 }
  0x19   :  { %652 = shalt.err (!%p649_p10)
}
  0x1a   :  { %s653_s24 = scalar_lea.vmem %s764_s27, 256  ;;  %p658_p12 = scmp.lt.s32.totalorder %s764_s27, %s764_s27 }
  0x1b   :  { %p654_p11 = scmp.ne.s32.totalorder %s764_s27, %s653_s24  ;;  %p659_p13 = scmp.lt.s32.totalorder %s653_s24, %s653_s24 }
  0x1d   :  { %p660_p0 = por %p659_p13, %p658_p12 }
  0x1f   :  { %p661_p1 = pnand %p660_p0, %p654_p11 }
  0x21   :  { %664 = shalt.err (!%p661_p1)
}
  0x22   :  { %26 = dma.hbm_to_vmem [thread:$0]  %s840_s0, 256, %s764_s27, [#allocation5], %s717_s13, %s717_s13, %s718_s14  }
  0x23   :  { %s719_s26 = smov [#allocation9]   ;;  %s665_s8 = scalar_lea.hbm %s845_s5, 2048 }
  0x24   :  { %s50_s28 = sshll.u32 %s719_s26, 4  ;;  %p666_p2 = scmp.ne.s32.totalorder %s845_s5, %s665_s8  ;;  %s51_s28 = int_to_ptr.vmem [resolvable:$true] %s50_s28 }
  0x25   :  { %p669_p3 = scmp.lt.u32.totalorder %s665_s8, %s845_s5 }
  0x27   :  { %p671_p4 = pnand %p669_p3, %p666_p2 }
  0x29   :  { %674 = shalt.err (!%p671_p4)
}
  0x2a   :  { %s675_s15 = scalar_lea.vmem %s51_s28, 2048  ;;  %p680_p6 = scmp.lt.s32.totalorder %s51_s28, %s51_s28 }
  0x2b   :  { %p676_p5 = scmp.ne.s32.totalorder %s51_s28, %s675_s15  ;;  %p681_p7 = scmp.lt.s32.totalorder %s675_s15, %s675_s15 }
  0x2d   :  { %p682_p8 = por %p681_p7, %p680_p6 }
  0x2f   :  { %p683_p9 = pnand %p682_p8, %p676_p5 }
  0x31   :  { %686 = shalt.err (!%p683_p9)
}
  0x32   :  { %s720_s0 = smov 64   ;;  %s721_s27 = smov 4  }
  0x33   :  { %56 = dma.hbm_to_vmem [thread:$0]  %s845_s5, 2048, %s51_s28, [#allocation8], %s720_s0, %s720_s0, %s721_s27  }
  0x34   :  { %709 = dma.done.wait [#allocation5], 256  }
  0x35   :  { %710 = vsyncadd [#allocation5], 4294967040 }
  0x36   :  { %711 = dma.done.wait [#allocation8], 4096  }
  0x37   :  { %712 = vsyncadd [#allocation8], 4294963200  ;;  %v73_v0 = vld [vmem:[#allocation4] sm:$0xff]  ;;  %v74_v1 = vld [vmem:[#allocation4 + $0x8] sm:$0xff]  ;;  %v722_v21 = vmov 0   ;;  %v139_v60 = vlaneseq  ;;  %s723_s22 = smov [#allocation10]  }
  0x38   :  { %75 = vadd.xlane.f32.xlu0 %v73_v0  ;;  %v569_v2 = vld [vmem:[#allocation7 + $0x4] ss:$8 sps:$4 sm:$0xff]   ;;  %v571_v3 = vld [vmem:[#allocation7] ss:$8 sps:$4 sm:$0xff]   ;;  %v572_v4 = vld [vmem:[#allocation7 + $0x14] ss:$8 sps:$4 sm:$0xff]   ;;  %261 = vmatprep.mubr.bf16.mxu0 %v722_v21 }
  0x39   :  { %229 = vmatprep.subr.bf16.mxu0 %v569_v2  ;;  %v574_v13 = vld [vmem:[#allocation7 + $0x10] ss:$8 sps:$4 sm:$0xff]   ;;  %v575_v14 = vld [vmem:[#allocation7 + $0x24] ss:$8 sps:$4 sm:$0xff]   ;;  %v577_v15 = vld [vmem:[#allocation7 + $0x20] ss:$8 sps:$4 sm:$0xff]  }
  0x3a   :  { %230 = vmatpush1.bf16.msra.mxu0 %v571_v3  ;;  %v578_v16 = vld [vmem:[#allocation7 + $0x34] ss:$8 sps:$4 sm:$0xff]   ;;  %v580_v17 = vld [vmem:[#allocation7 + $0x30] ss:$8 sps:$4 sm:$0xff]   ;;  %v581_v18 = vld [vmem:[#allocation7 + $0x44] ss:$8 sps:$4 sm:$0xff]  }
  0x3b   :  { %231 = vmatprep.subr.bf16.mxu0 %v572_v4  ;;  %v583_v19 = vld [vmem:[#allocation7 + $0x40] ss:$8 sps:$4 sm:$0xff]   ;;  %v584_v20 = vld [vmem:[#allocation7 + $0x54] ss:$8 sps:$4 sm:$0xff]   ;;  %v586_v22 = vld [vmem:[#allocation7 + $0x50] ss:$8 sps:$4 sm:$0xff]  }
  0x3c   :  { %77 = vadd.xlane.f32.xlu0 %v74_v1  ;;  %v587_v23 = vld [vmem:[#allocation7 + $0x64] ss:$8 sps:$4 sm:$0xff]   ;;  %v589_v24 = vld [vmem:[#allocation7 + $0x60] ss:$8 sps:$4 sm:$0xff]   ;;  %v590_v25 = vld [vmem:[#allocation7 + $0x74] ss:$8 sps:$4 sm:$0xff]  }
  0x3d   :  { %v592_v26 = vld [vmem:[#allocation7 + $0x70] ss:$8 sps:$4 sm:$0xff]   ;;  %v593_v27 = vld [vmem:[#allocation9 + $0x40] sm:$0xff]   ;;  %v595_v29 = vld [vmem:[#allocation9 + $0x48] sm:$0xff]   ;;  %v140_v61 = vshrl.u32 %v139_v60, 7  ;;  %s490_s23 = sshll.u32 %s723_s22, 4  ;;  %s491_s23 = int_to_ptr.vmem [resolvable:$true] %s490_s23 }
  0x3e   :  { %232 = vmatpush1.bf16.msra.mxu0 %v574_v13  ;;  %v594_v28 = vld [vmem:[#allocation9] sm:$0xff]   ;;  %538 = vmatprep.subr.bf16.mxu1 %v593_v27  ;;  %v596_v30 = vld [vmem:[#allocation9 + $0x8] sm:$0xff]   ;;  %v503_v39 = vld [vmem:[%s841_s1] ss:$0 sm:$0xff]  ;;  %s687_s24 = scalar_lea.vmem %s491_s23, 256  ;;  %p692_p11 = scmp.lt.s32.totalorder %s491_s23, %s491_s23 }
  0x3f   :  { %233 = vmatprep.subr.bf16.mxu0 %v575_v14  ;;  %539 = vmatpush3.bf16.msra.mxu1 %v594_v28  ;;  %v504_v43 = vld [vmem:[%s842_s2] ss:$0 sm:$0xff]  ;;  %v599_v50 = vld [vmem:[#allocation9 + $0x58] sm:$0xff]   ;;  %v601_v52 = vld [vmem:[#allocation9 + $0x60] sm:$0xff]   ;;  %v141_v62 = vsub.s32 0, %v140_v61  ;;  %p688_p10 = scmp.ne.s32.totalorder %s491_s23, %s687_s24  ;;  %p693_p12 = scmp.lt.s32.totalorder %s687_s24, %s687_s24 }
  0x40   :  { %540 = vmatprep.subr.bf16.mxu1 %v595_v29  ;;  %v597_v48 = vld [vmem:[#allocation9 + $0x50] sm:$0xff]   ;;  %v600_v51 = vld [vmem:[#allocation9 + $0x18] sm:$0xff]   ;;  %v602_v53 = vld [vmem:[#allocation9 + $0x20] sm:$0xff]  }
  0x41   :  { %v598_v49 = vld [vmem:[#allocation9 + $0x10] sm:$0xff]   ;;  %v603_v54 = vld [vmem:[#allocation9 + $0x68] sm:$0xff]   ;;  %v607_v58 = vld [vmem:[#allocation9 + $0x78] sm:$0xff]   ;;  %p694_p13 = por %p693_p12, %p692_p11 }
  0x42   :  { %234 = vmatpush1.bf16.msra.mxu0 %v577_v15  ;;  %v604_v55 = vld [vmem:[#allocation9 + $0x28] sm:$0xff]   ;;  %v605_v56 = vld [vmem:[#allocation9 + $0x70] sm:$0xff]   ;;  %v608_v59 = vld [vmem:[#allocation9 + $0x38] sm:$0xff]  }
  0x43   :  { %235 = vmatprep.subr.bf16.mxu0 %v578_v16  ;;  %541 = vmatpush3.bf16.msra.mxu1 %v596_v30  ;;  %v606_v57 = vld [vmem:[#allocation9 + $0x30] sm:$0xff]   ;;  %p695_p0 = pnand %p694_p13, %p688_p10 }
  0x44   :  { %542 = vmatprep.subr.bf16.mxu1 %v597_v48  ;;  %v137_v63 = vld [vmem:[%s844_s4] sm:$0x3] }
  0x46   :  { %236 = vmatpush1.bf16.msra.mxu0 %v580_v17 }
  0x47   :  { %237 = vmatprep.subr.bf16.mxu0 %v581_v18  ;;  %543 = vmatpush3.bf16.msra.mxu1 %v598_v49 }
  0x48   :  { %544 = vmatprep.subr.bf16.mxu1 %v599_v50 }
  0x4a   :  { %238 = vmatpush1.bf16.msra.mxu0 %v583_v19 }
  0x4b   :  { %239 = vmatprep.subr.bf16.mxu0 %v584_v20  ;;  %545 = vmatpush3.bf16.msra.mxu1 %v600_v51 }
  0x4c   :  { %546 = vmatprep.subr.bf16.mxu1 %v601_v52 }
  0x4e   :  { %240 = vmatpush1.bf16.msra.mxu0 %v586_v22 }
  0x4f   :  { %241 = vmatprep.subr.bf16.mxu0 %v587_v23  ;;  %547 = vmatpush3.bf16.msra.mxu1 %v602_v53 }
  0x50   :  { %548 = vmatprep.subr.bf16.mxu1 %v603_v54 }
  0x52   :  { %242 = vmatpush1.bf16.msra.mxu0 %v589_v24 }
  0x53   :  { %243 = vmatprep.subr.bf16.mxu0 %v590_v25  ;;  %549 = vmatpush3.bf16.msra.mxu1 %v604_v55 }
  0x54   :  { %550 = vmatprep.subr.bf16.mxu1 %v605_v56 }
  0x56   :  { %244 = vmatpush1.bf16.msra.mxu0 %v592_v26 }
  0x57   :  { %551 = vmatpush3.bf16.msra.mxu1 %v606_v57 }
  0x58   :  { %552 = vmatprep.subr.bf16.mxu1 %v607_v58 }
  0x5b   :  { %553 = vmatpush3.bf16.msra.mxu1 %v608_v59 }
  0xc5   :  { %v76_v5 = vpop.xlane.xlu0 %75 }
  0xc6   :  { %v80_v6 = vmul.f32 0.0078125, %v76_v5 }
  0xc8   :  { %v82_v7 = vsub.f32 %v73_v0, %v80_v6  ;;  %v145_v0 = vsub.s32 1, %v140_v61 }
  0xc9   :  { %v78_v8 = vpop.xlane.xlu0 %77 }
  0xca   :  { %v81_v9 = vmul.f32 0.0078125, %v78_v8  ;;  %v84_v10 = vmul.f32 %v82_v7, %v82_v7  ;;  %v146_v2 = vrot.slane %v137_v63, %v145_v0 }
  0xcc   :  { %v83_v11 = vsub.f32 %v74_v1, %v81_v9  ;;  %86 = vadd.xlane.f32.xlu1 %v84_v10  ;;  %v142_v1 = vrot.slane %v137_v63, %v141_v62 }
  0xce   :  { %v85_v12 = vmul.f32 %v83_v11, %v83_v11 }
  0xd0   :  { %88 = vadd.xlane.f32.xlu1 %v85_v12 }
 0x159   :  { %v87_v31 = vpop.xlane.xlu1 %86 }
 0x15a   :  { %v90_v32 = vmul.f32 0.0078125, %v87_v31 }
 0x15c   :  { %v92_v33 = vadd.f32 1e-05, %v90_v32 }
 0x15d   :  { %v89_v34 = vpop.xlane.xlu1 %88 }
 0x15e   :  { %609 = vrsqrt.f32 %v92_v33  ;;  %v91_v35 = vmul.f32 0.0078125, %v89_v34 }
 0x160   :  { %v93_v36 = vadd.f32 1e-05, %v91_v35  ;;  %v537_v35 = vld [vmem:[%s846_s6] ss:$0 sm:$0xff] }
 0x162   :  { %611 = vrsqrt.f32 %v93_v36 }
 0x168   :  { %v610_v37 = vpop.eup %609 }
 0x169   :  { %v96_v38 = vmul.f32 %v610_v37, %v82_v7 }
 0x16b   :  { %v105_v42 = vmul.f32 %v503_v39, %v96_v38 }
 0x16c   :  { %v612_v40 = vpop.eup %611 }
 0x16d   :  { %v97_v41 = vmul.f32 %v612_v40, %v83_v11  ;;  %v114_v45 = vadd.f32 %v504_v43, %v105_v42 }
 0x16f   :  { %v106_v44 = vmul.f32 %v503_v39, %v97_v41 }
 0x171   :  { %v115_v46 = vadd.f32 %v504_v43, %v106_v44 }
 0x173   :  { %v116_v47 = vpack.c.bf16 %v115_v46, %v114_v45 }
 0x175   :  { %262 = vmatmul.mubr.bf16.vlgmr.msra.gmra.mrb[0].mxu0 %v116_v47 }
 0x248   :  { %v263_v3 = vpop.f32.mrb[0].mxu0 }
 0x249   :  { %v264_v4 = vadd.f32 %v263_v3, %v142_v1  ;;  %v265_v5 = vpop.f32.mrb[1].mxu0 }
 0x24a   :  { %v266_v6 = vadd.f32 %v265_v5, %v146_v2  ;;  %v267_v7 = vpop.f32.mrb[2].mxu0 }
 0x24b   :  { %v276_v8 = vmul.f32 0.70710677, %v264_v4  ;;  %v268_v9 = vadd.f32 %v267_v7, %v142_v1  ;;  %v269_v10 = vpop.f32.mrb[3].mxu0  ;;  %v272_v21 = vmul.f32 0.5, %v264_v4 }
 0x24c   :  { %v277_v11 = vmul.f32 0.70710677, %v266_v6  ;;  %v270_v12 = vadd.f32 %v269_v10, %v146_v2  ;;  %v273_v24 = vmul.f32 0.5, %v266_v6 }
 0x24d   :  { %613 = verf.f32 %v276_v8  ;;  %v278_v13 = vmul.f32 0.70710677, %v268_v9  ;;  %v274_v22 = vmul.f32 0.5, %v268_v9 }
 0x24e   :  { %615 = verf.f32 %v277_v11  ;;  %v279_v14 = vmul.f32 0.70710677, %v270_v12  ;;  %v275_v25 = vmul.f32 0.5, %v270_v12 }
 0x24f   :  { %617 = verf.f32 %v278_v13 }
 0x250   :  { %619 = verf.f32 %v279_v14 }
 0x257   :  { %v614_v15 = vpop.eup %613 }
 0x258   :  { %v616_v16 = vpop.eup %615  ;;  %v284_v17 = vadd.f32 1.0, %v614_v15 }
 0x259   :  { %v618_v18 = vpop.eup %617  ;;  %v285_v19 = vadd.f32 1.0, %v616_v16 }
 0x25a   :  { %v620_v20 = vpop.eup %619  ;;  %v286_v23 = vadd.f32 1.0, %v618_v18  ;;  %v288_v27 = vmul.f32 %v284_v17, %v272_v21 }
 0x25b   :  { %v287_v26 = vadd.f32 1.0, %v620_v20  ;;  %v289_v29 = vmul.f32 %v285_v19, %v273_v24 }
 0x25c   :  { %v290_v28 = vmul.f32 %v286_v23, %v274_v22 }
 0x25d   :  { %v291_v30 = vmul.f32 %v287_v26, %v275_v25 }
 0x25e   :  { %v294_v31 = vpack.c.bf16 %v290_v28, %v288_v27 }
 0x25f   :  { %v295_v32 = vpack.c.bf16 %v291_v30, %v289_v29 }
 0x261   :  { %456 = vmatprep.mubr.bf16.mxu1 %v295_v32 }
 0x262   :  { %457 = vmatmul.mubr.bf16.vlgmr.msra.gmra.mrb[0].mxu1 %v294_v31 }
 0x335   :  { %v554_v33 = vpop.f32.mrb[0].mxu1 }
 0x336   :  { %v555_v34 = vpop.f32.mrb[1].mxu1 }
 0x337   :  { %v556_v36 = vadd.f32 %v555_v34, %v554_v33  ;;  %v557_v37 = vpop.f32.mrb[2].mxu1 }
 0x338   :  { %v558_v38 = vpop.f32.mrb[3].mxu1 }
 0x339   :  { %v481_v39 = vadd.f32 %v556_v36, %v537_v35  ;;  %v559_v40 = vadd.f32 %v558_v38, %v557_v37 }
 0x33b   :  { %483 = vst [vmem:[#allocation10] sm:$0xff] %v481_v39  ;;  %v482_v41 = vadd.f32 %v559_v40, %v537_v35 }
 0x33d   :  { %484 = vst [vmem:[#allocation10 + $0x8] sm:$0xff] %v482_v41 }
 0x33e   :  { %698 = shalt.err (!%p695_p0)
}
 0x33f   :  { %s699_s25 = scalar_lea.hbm %s847_s7, 256 }
 0x340   :  { %p700_p1 = scmp.ne.s32.totalorder %s847_s7, %s699_s25  ;;  %p703_p2 = scmp.lt.u32.totalorder %s699_s25, %s847_s7 }
 0x342   :  { %p705_p3 = pnand %p703_p2, %p700_p1 }
 0x344   :  { %708 = shalt.err (!%p705_p3)
}
 0x345   :  { %496 = dma.vmem_to_hbm [thread:$0]  %s491_s23, 256, %s847_s7, [#allocation6], %s717_s13, %s717_s13, %s718_s14  }
 0x346   :  { %713 = dma.done.wait [#allocation6], 256  }
 0x347   :  { %714 = vsyncadd [#allocation6], 4294967040 }
 0x348   :  { %500 = vsyncpa [#allocation5], 1 }
 0x349   :  { %501 = vsyncpa [#allocation8], 1 }
 0x34a   :  { %502 = vsyncpa [#allocation6], 1 }

</bundles_post_ra>
